<compile_context>
chip_gen: v6e
topology: v6e:2x2x1
jax: 0.10.0
libtpu: 0.0.40
codegen_flags: <defaults>
</compile_context>

<pallas_src>
import functools

import jax
import jax.numpy as jnp
from jax.experimental import pallas as pl
from jax.experimental.pallas import tpu as pltpu

_LANE = 128          # vreg lane width
_SUBLANE = 8         # f32 sublane count
_MIN_GRID_STEPS = 4  # give the pipeline something to overlap; engage both v7x TCs


def _round_up(n, m):
    return ((n + m - 1) // m) * m


def _pad_lanes(n):
    """Lane-dense padding: 128-aligned, 256-aligned once past one MXU tile
    (v6e/v7x MXUs are 256 wide; on v5e the extra <=128 lanes are harmless)."""
    p = _round_up(n, _LANE)
    return _round_up(n, 2 * _LANE) if p >= 2 * _LANE else p


@functools.lru_cache(maxsize=1)
def _vmem_capacity_bytes():
    """Per-core VMEM capacity (128 MiB on v5e/v6e, 64 MiB per TC on v7x).
    Conservative fallback if the query is unavailable."""
    try:
        info = pltpu.get_tpu_info()
        cap = int(getattr(info, "vmem_capacity_bytes", 0))
        if cap > 0:
            return cap
    except Exception:
        pass
    return 64 * 1024 * 1024  # v7x per-TC value: safe lower bound everywhere


# ---------------------------------------------------------------------------
# Kernel: one batch tile of  out = relu(x @ W1 + b1) @ W2 + b2
# x arrives in its native dtype and is cast here (VPU, free vs. an extra HBM
# pass in the wrapper).  Weights arrive pre-transposed to [in, out] in the
# compute dtype; both matmuls accumulate in f32 on the MXU, bias + ReLU run on
# the f32 accumulator, and the result is stored directly in the output dtype.
# ---------------------------------------------------------------------------
def mlp_kernel(x_ref, w1_ref, b1_ref, w2_ref, b2_ref, o_ref):
    x = x_ref[...].astype(w1_ref.dtype)            # in-kernel cast (no-op for f32)
    h = jnp.dot(x, w1_ref[...], preferred_element_type=jnp.float32)
    h = jnp.maximum(h + b1_ref[...], 0.0)          # f32 bias add + ReLU (VPU)
    h = h.astype(w2_ref.dtype)                     # back to compute dtype for MXU
    out = jnp.dot(h, w2_ref[...], preferred_element_type=jnp.float32)
    o_ref[...] = (out + b2_ref[...]).astype(o_ref.dtype)


# ---------------------------------------------------------------------------
# One-time parameter preparation (layout work kept OUT of the per-call path):
# transpose to [in, out], zero-pad N dims to lane-dense widths, cast weights to
# the MXU compute dtype.  Biases stay f32 (added on the f32 accumulator).
# ---------------------------------------------------------------------------
def prepare_params(w1, b1, w2, b2, compute_dtype=jnp.bfloat16):
    hidden, in_dim = w1.shape
    out_dim, hidden2 = w2.shape
    assert hidden2 == hidden
    hid_p = _pad_lanes(hidden)
    out_p = _pad_lanes(out_dim)

    # TODO(synk): if in_dim is not a multiple of 128 AND the kernel becomes
    # MXU-bound, zero-pad K here too -- that requires a matching per-call pad of
    # x's last dim, which conflicts with the zero-extra-HBM-pass wrapper below.

    w1_t = jnp.zeros((in_dim, hid_p), compute_dtype)
    w1_t = w1_t.at[:, :hidden].set(w1.T.astype(compute_dtype))
    b1_r = jnp.zeros((1, hid_p), jnp.float32).at[:, :hidden].set(b1.astype(jnp.float32))

    w2_t = jnp.zeros((hid_p, out_p), compute_dtype)
    w2_t = w2_t.at[:hidden, :out_dim].set(w2.T.astype(compute_dtype))
    b2_r = jnp.zeros((1, out_p), jnp.float32).at[:, :out_dim].set(b2.astype(jnp.float32))

    return (w1_t, b1_r, w2_t, b2_r), out_dim


def _vmem_estimate(tb, in_dim, hid_p, out_p, w_itemsize, x_itemsize, out_itemsize):
    # Weights/biases have constant index maps (fetched once) but Pallas still
    # double-buffers every input by default -> count them x2 so the limit is
    # never silently exceeded on v7x.  (pl.Buffered(1) on those specs would
    # reclaim half of this where supported.)
    weight_bytes = 2 * ((in_dim * hid_p + hid_p * out_p) * w_itemsize
                        + (hid_p + out_p) * 4)
    # Streamed x / out tiles, double-buffered, in their real dtypes.
    io_bytes = 2 * tb * (in_dim * x_itemsize + out_p * out_itemsize)
    # Live intermediates inside the body: f32 accumulators + casted copies.
    live_bytes = tb * ((hid_p + out_p) * 4 + in_dim * w_itemsize + hid_p * w_itemsize)
    return weight_bytes + io_bytes + live_bytes


def _pick_batch_tile(B, in_dim, hid_p, out_p, w_itemsize, x_itemsize, out_itemsize,
                     row_align, budget_bytes):
    """Largest batch tile (row_align-aligned, <=1024 rows) that fits the VMEM
    budget while leaving >= _MIN_GRID_STEPS grid steps when B is big enough."""
    target = _round_up(max(pl.cdiv(B, _MIN_GRID_STEPS), 1), row_align)
    tb = max(row_align, min(target, 1024))
    while tb > row_align and _vmem_estimate(
            tb, in_dim, hid_p, out_p, w_itemsize, x_itemsize, out_itemsize) > budget_bytes:
        tb = max(row_align, _round_up(tb // 2, row_align))
    return tb


@functools.partial(jax.jit, static_argnames=("out_dim",))
def net_forward(x, w1_t, b1_r, w2_t, b2_r, *, out_dim):
    """x: [B, input_size] in its native dtype; prepared params from prepare_params()."""
    B, in_dim = x.shape
    assert w1_t.shape[0] == in_dim
    hid_p = w1_t.shape[1]
    out_p = w2_t.shape[1]
    compute_dtype = w1_t.dtype
    out_dtype = x.dtype

    w_itemsize = jnp.dtype(compute_dtype).itemsize
    x_itemsize = jnp.dtype(x.dtype).itemsize
    out_itemsize = jnp.dtype(out_dtype).itemsize
    row_align = max(_SUBLANE, 32 // w_itemsize)   # 8 rows for f32, 16 for bf16

    cap = _vmem_capacity_bytes()                  # per-TC capacity (weights replicated per TC)
    budget = int(0.70 * cap)                      # tile-selection budget
    ceiling = int(0.875 * cap)                    # scoped limit: ~56 MiB v7x, ~112 MiB v5e/v6e

    tb = _pick_batch_tile(B, in_dim, hid_p, out_p,
                          w_itemsize, x_itemsize, out_itemsize, row_align, budget)
    grid = (pl.cdiv(B, tb),)                      # last tile may be partial (rows independent)

    est = _vmem_estimate(tb, in_dim, hid_p, out_p, w_itemsize, x_itemsize, out_itemsize)
    vmem_limit = int(min(max(2 * est, 32 * 1024 * 1024), ceiling))

    # TODO(synk): for models whose resident weights exceed ~40 MiB (v7x) /
    # ~90 MiB (v5e/v6e), add a trailing "arbitrary" K grid axis over the hidden
    # dim with an f32 scratch accumulator (pl.when init/finalize) so the
    # weights no longer need to be fully VMEM-resident.
    out_padded = pl.pallas_call(
        mlp_kernel,
        out_shape=jax.ShapeDtypeStruct((B, out_p), out_dtype),
        grid=grid,
        in_specs=[
            pl.BlockSpec((tb, in_dim), lambda i: (i, 0)),      # x: streamed per step
            pl.BlockSpec((in_dim, hid_p), lambda i: (0, 0)),   # W1: VMEM-resident
            pl.BlockSpec((1, hid_p), lambda i: (0, 0)),        # b1
            pl.BlockSpec((hid_p, out_p), lambda i: (0, 0)),    # W2: VMEM-resident
            pl.BlockSpec((1, out_p), lambda i: (0, 0)),        # b2
        ],
        out_specs=pl.BlockSpec((tb, out_p), lambda i: (i, 0)),
        compiler_params=pltpu.CompilerParams(
            dimension_semantics=("parallel",),   # v7x: shard batch tiles over 2 TCs
            vmem_limit_bytes=vmem_limit,
        ),
    )(x, w1_t, b1_r, w2_t, b2_r)

    # Drop lane padding of the output dim (callers that can consume the padded
    # (B, out_p) slab may skip this slice).
    return out_padded[:, :out_dim]


def init_params(key, input_size, hidden_size, output_size):
    """Deterministic init mirroring nn.Linear's U(-1/sqrt(fan_in), 1/sqrt(fan_in))."""
    k1, k2, k3, k4 = jax.random.split(key, 4)
    bound1 = 1.0 / jnp.sqrt(jnp.float32(input_size))
    bound2 = 1.0 / jnp.sqrt(jnp.float32(hidden_size))
    w1 = jax.random.uniform(k1, (hidden_size, input_size), jnp.float32, -bound1, bound1)
    b1 = jax.random.uniform(k2, (hidden_size,), jnp.float32, -bound1, bound1)
    w2 = jax.random.uniform(k3, (output_size, hidden_size), jnp.float32, -bound2, bound2)
    b2 = jax.random.uniform(k4, (output_size,), jnp.float32, -bound2, bound2)
    return w1, b1, w2, b2


if __name__ == "__main__":
    batch, input_size, hidden_size, output_size = 8, 64, 32, 16

    key = jax.random.PRNGKey(0)
    kx, kp = jax.random.split(key)
    x = jax.random.normal(kx, (batch, input_size), jnp.float32)
    w1, b1, w2, b2 = init_params(kp, input_size, hidden_size, output_size)

    # Pure-JAX reference (PyTorch semantics: fc2(relu(fc1(x)))).
    ref = jnp.maximum(x @ w1.T + b1, 0.0) @ w2.T + b2

    # f32 compute path: tight check (exact forward semantics).
    p_f32, out_dim = prepare_params(w1, b1, w2, b2, compute_dtype=jnp.float32)
    out_f32 = jax.block_until_ready(net_forward(x, *p_f32, out_dim=out_dim))
    assert out_f32.shape == (batch, output_size)
    assert out_f32.dtype == x.dtype
    assert jnp.allclose(out_f32, ref, atol=1e-5, rtol=1e-5)

    # bf16 compute path (production default): bf16 MXU inputs, f32 accumulation,
    # x streamed in f32 and cast in-kernel, partial (masked) batch tile.
    p_bf16, out_dim = prepare_params(w1, b1, w2, b2, compute_dtype=jnp.bfloat16)
    out_bf16 = jax.block_until_ready(net_forward(x, *p_bf16, out_dim=out_dim))
    assert out_bf16.shape == (batch, output_size)
    assert jnp.allclose(out_bf16, ref, atol=5e-2, rtol=5e-2)

    print("KERNEL_OK")
</pallas_src>

<mosaic_0001>
module attributes {stable_mosaic.version = 11 : i64} {
  func.func @mlp_kernel(%arg0: i32, %arg1: memref<8x64xf32, #tpu.memory_space<vmem>>, %arg2: memref<64x128xf32, #tpu.memory_space<vmem>>, %arg3: memref<1x128xf32, #tpu.memory_space<vmem>>, %arg4: memref<128x128xf32, #tpu.memory_space<vmem>>, %arg5: memref<1x128xf32, #tpu.memory_space<vmem>>, %arg6: memref<8x128xf32, #tpu.memory_space<vmem>>) attributes {dimension_semantics = [#tpu.dimension_semantics<parallel>], iteration_bounds = array<i64: 1>, scalar_prefetch = 0 : i64, scratch_operands = 0 : i64, tpu.core_type = #tpu.core_type<tc>, window_params = [{transform_indices = @transform_0, window_bounds = array<i64: 8, 64>}, {pipeline_mode = #tpu.pipeline_mode<synchronous>, transform_indices = @transform_1, window_bounds = array<i64: 64, 128>}, {pipeline_mode = #tpu.pipeline_mode<synchronous>, transform_indices = @transform_2, window_bounds = array<i64: 1, 128>}, {pipeline_mode = #tpu.pipeline_mode<synchronous>, transform_indices = @transform_3, window_bounds = array<i64: 128, 128>}, {pipeline_mode = #tpu.pipeline_mode<synchronous>, transform_indices = @transform_4, window_bounds = array<i64: 1, 128>}, {transform_indices = @transform_5, window_bounds = array<i64: 8, 128>}]} {
    %c0 = arith.constant 0 : index
    %c0_0 = arith.constant 0 : index
    %0 = vector.load %arg1[%c0, %c0_0] : memref<8x64xf32, #tpu.memory_space<vmem>>, vector<8x64xf32>
    %c0_1 = arith.constant 0 : index
    %c0_2 = arith.constant 0 : index
    %1 = vector.load %arg2[%c0_1, %c0_2] : memref<64x128xf32, #tpu.memory_space<vmem>>, vector<64x128xf32>
    %cst = arith.constant dense<0.000000e+00> : vector<8x128xf32>
    %2 = tpu.matmul %0, %1, %cst {dimension_numbers = #tpu.dot_dimension_numbers<[1], [0], [0], [1], [0, 0, 1, 1], [], []>} : vector<8x64xf32>, vector<64x128xf32>, vector<8x128xf32> -> vector<8x128xf32>
    %c0_3 = arith.constant 0 : index
    %c0_4 = arith.constant 0 : index
    %3 = vector.load %arg3[%c0_3, %c0_4] : memref<1x128xf32, #tpu.memory_space<vmem>>, vector<1x128xf32>
    %4 = vector.broadcast %3 : vector<1x128xf32> to vector<8x128xf32>
    %5 = arith.addf %2, %4 : vector<8x128xf32>
    %cst_5 = arith.constant 0.000000e+00 : f32
    %6 = vector.broadcast %cst_5 : f32 to vector<8x128xf32>
    %7 = arith.maximumf %5, %6 : vector<8x128xf32>
    %c0_6 = arith.constant 0 : index
    %c0_7 = arith.constant 0 : index
    %8 = vector.load %arg4[%c0_6, %c0_7] : memref<128x128xf32, #tpu.memory_space<vmem>>, vector<128x128xf32>
    %cst_8 = arith.constant dense<0.000000e+00> : vector<8x128xf32>
    %9 = tpu.matmul %7, %8, %cst_8 {dimension_numbers = #tpu.dot_dimension_numbers<[1], [0], [0], [1], [0, 0, 1, 1], [], []>} : vector<8x128xf32>, vector<128x128xf32>, vector<8x128xf32> -> vector<8x128xf32>
    %c0_9 = arith.constant 0 : index
    %c0_10 = arith.constant 0 : index
    %10 = vector.load %arg5[%c0_9, %c0_10] : memref<1x128xf32, #tpu.memory_space<vmem>>, vector<1x128xf32>
    %11 = vector.broadcast %10 : vector<1x128xf32> to vector<8x128xf32>
    %12 = arith.addf %9, %11 : vector<8x128xf32>
    %c0_11 = arith.constant 0 : index
    %c0_12 = arith.constant 0 : index
    %13 = vector.load %arg6[%c0_11, %c0_12] : memref<8x128xf32, #tpu.memory_space<vmem>>, vector<8x128xf32>
    tpu.vector_store %arg6[%c0_11, %c0_12], %12 {strides = array<i32>} : memref<8x128xf32, #tpu.memory_space<vmem>>, vector<8x128xf32>,
    return
  }
  func.func @transform_0(%arg0: i32) -> (i32, i32) {
    %c0_i32 = arith.constant 0 : i32
    %c0_i32_0 = arith.constant 0 : i32
    return %arg0, %c0_i32 : i32, i32
  }
  func.func @transform_1(%arg0: i32) -> (i32, i32) {
    %c0_i32 = arith.constant 0 : i32
    %c0_i32_0 = arith.constant 0 : i32
    %c0_i32_1 = arith.constant 0 : i32
    return %c0_i32, %c0_i32_0 : i32, i32
  }
  func.func @transform_2(%arg0: i32) -> (i32, i32) {
    %c0_i32 = arith.constant 0 : i32
    %c0_i32_0 = arith.constant 0 : i32
    %c0_i32_1 = arith.constant 0 : i32
    return %c0_i32, %c0_i32_0 : i32, i32
  }
  func.func @transform_3(%arg0: i32) -> (i32, i32) {
    %c0_i32 = arith.constant 0 : i32
    %c0_i32_0 = arith.constant 0 : i32
    %c0_i32_1 = arith.constant 0 : i32
    return %c0_i32, %c0_i32_0 : i32, i32
  }
  func.func @transform_4(%arg0: i32) -> (i32, i32) {
    %c0_i32 = arith.constant 0 : i32
    %c0_i32_0 = arith.constant 0 : i32
    %c0_i32_1 = arith.constant 0 : i32
    return %c0_i32, %c0_i32_0 : i32, i32
  }
  func.func @transform_5(%arg0: i32) -> (i32, i32) {
    %c0_i32 = arith.constant 0 : i32
    %c0_i32_0 = arith.constant 0 : i32
    return %arg0, %c0_i32 : i32, i32
  }
}

</mosaic_0001>

<bundles_post_ra>
// kernel: net_forward.1
= control target key start
LH: loop header
LB: loop body
LE: loop exit
PB: predicated region body
PF: predicated region fallthrough
CT: control target
= control target key end

     0   :  { %10 = vsyncpa [#allocation3], 0  ;;  %s520_s0 = inlined_call_operand.hbm [shape: f32[8,64], index: 0, kind: input, shape index: {}]   ;;  %s521_s1 = inlined_call_operand.hbm [shape: f32[64,128], index: 1, kind: input, shape index: {}]   ;;  %s522_s2 = inlined_call_operand.vmem [shape: f32[1,128], index: 2, kind: input, shape index: {}]   ;;  %s523_s3 = inlined_call_operand.hbm [shape: f32[128,128], index: 3, kind: input, shape index: {}]   ;;  %s524_s4 = inlined_call_operand.vmem [shape: f32[1,128], index: 4, kind: input, shape index: {}]   ;;  %s525_s5 = inlined_call_operand.hbm [shape: f32[8,128], index: 5, kind: output, shape index: {}]  }
   0x1   :  { %11 = vsyncpa [#allocation6], 0 }
   0x2   :  { %12 = vsyncpa [#allocation4], 0  ;;  %s438_s18 = smov [#allocation5]  }
   0x3   :  { %s28_s19 = sshll.u32 %s438_s18, 4  ;;  %s29_s19 = int_to_ptr.vmem [resolvable:$true] %s28_s19 }
   0x4   :  { %s360_s20 = scalar_lea.vmem %s29_s19, 1024  ;;  %p365_p1 = scmp.lt.s32.totalorder %s29_s19, %s29_s19 }
   0x5   :  { %p361_p0 = scmp.ne.s32.totalorder %s29_s19, %s360_s20  ;;  %p366_p2 = scmp.lt.s32.totalorder %s360_s20, %s360_s20 }
   0x7   :  { %p367_p3 = por %p366_p2, %p365_p1 }
   0x9   :  { %p368_p4 = pnand %p367_p3, %p361_p0 }
   0xb   :  { %371 = shalt.err (!%p368_p4)
}
   0xc   :  { %s439_s21 = smov 128   ;;  %s440_s22 = smov 8  }
   0xd   :  { %34 = dma.hbm_to_vmem [thread:$0]  %s521_s1, 1024, %s29_s19, [#allocation6], %s439_s21, %s439_s21, %s440_s22  }
   0xe   :  { %s441_s25 = smov [#allocation2]   ;;  %s442_s27 = smov [#allocation7]  }
   0xf   :  { %s19_s26 = sshll.u32 %s441_s25, 4  ;;  %s42_s28 = sshll.u32 %s442_s27, 4  ;;  %s20_s26 = int_to_ptr.vmem [resolvable:$true] %s19_s26  ;;  %s43_s28 = int_to_ptr.vmem [resolvable:$true] %s42_s28 }
  0x10   :  { %s380_s29 = scalar_lea.vmem %s20_s26, 128  ;;  %p385_p6 = scmp.lt.s32.totalorder %s20_s26, %s20_s26 }
  0x11   :  { %p381_p5 = scmp.ne.s32.totalorder %s20_s26, %s380_s29  ;;  %p386_p7 = scmp.lt.s32.totalorder %s380_s29, %s380_s29 }
  0x13   :  { %p387_p8 = por %p386_p7, %p385_p6 }
  0x15   :  { %p388_p9 = pnand %p387_p8, %p381_p5 }
  0x17   :  { %391 = shalt.err (!%p388_p9)
}
  0x18   :  { %22 = dma.hbm_to_vmem [thread:$0]  %s520_s0, 128, %s20_s26, [#allocation3]  }
  0x19   :  { %s400_s7 = scalar_lea.vmem %s43_s28, 2048  ;;  %p405_p11 = scmp.lt.s32.totalorder %s43_s28, %s43_s28 }
  0x1a   :  { %p401_p10 = scmp.ne.s32.totalorder %s43_s28, %s400_s7  ;;  %p406_p12 = scmp.lt.s32.totalorder %s400_s7, %s400_s7 }
  0x1c   :  { %p407_p13 = por %p406_p12, %p405_p11 }
  0x1e   :  { %p408_p0 = pnand %p407_p13, %p401_p10 }
  0x20   :  { %411 = shalt.err (!%p408_p0)
}
  0x21   :  { %48 = dma.hbm_to_vmem [thread:$0]  %s523_s3, 2048, %s43_s28, [#allocation6], %s439_s21, %s439_s21, %s440_s22  }
  0x22   :  { %432 = dma.done.wait [#allocation3], 128  }
  0x23   :  { %433 = vsyncadd [#allocation3], 4294967168 }
  0x24   :  { %434 = dma.done.wait [#allocation6], 3072  }
  0x25   :  { %435 = vsyncadd [#allocation6], 4294964224  ;;  %v443_v0 = vmov 0.0   ;;  %vm444_vm0 = vmmov 0   ;;  %v68_v1 = vld [vmem:[#allocation5 + $0x38] sm:$0xff]  ;;  %v67_v2 = vld [vmem:[#allocation5 + $0x30] sm:$0xff] }
  0x26   :  { %290 = vmatprep.subr.mxu0 %v443_v0  ;;  %306 = vmatprep.mubr.msk.f32.mxu0 %vm444_vm0, %v443_v0  ;;  %v66_v3 = vld [vmem:[#allocation5 + $0x28] sm:$0xff]  ;;  %v166_v4 = vld [vmem:[#allocation7 + $0x78] sm:$0xff]  ;;  %v165_v5 = vld [vmem:[#allocation7 + $0x70] sm:$0xff]  ;;  %vm76_vm1 = vcmask 523264   ;;  %s445_s11 = smov [#allocation8]  }
  0x27   :  { %309 = vmatprep.subr.mxu1 %v443_v0  ;;  %341 = vmatprep.mubr.msk.f32.mxu1 %vm444_vm0, %v443_v0  ;;  %v65_v6 = vld [vmem:[#allocation5 + $0x20] sm:$0xff]  ;;  %v164_v7 = vld [vmem:[#allocation7 + $0x68] sm:$0xff]  ;;  %v64_v8 = vld [vmem:[#allocation5 + $0x18] sm:$0xff]  ;;  %s251_s12 = sshll.u32 %s445_s11, 4  ;;  %s252_s12 = int_to_ptr.vmem [resolvable:$true] %s251_s12 }
  0x28   :  { %291 = vmatpush3.msra.mxu0 %v68_v1  ;;  %310 = vmatpush3.msra.mxu1 %v166_v4  ;;  %v163_v9 = vld [vmem:[#allocation7 + $0x60] sm:$0xff]  ;;  %v63_v10 = vld [vmem:[#allocation5 + $0x10] sm:$0xff]  ;;  %v162_v11 = vld [vmem:[#allocation7 + $0x58] sm:$0xff]  ;;  %s412_s13 = scalar_lea.vmem %s252_s12, 128  ;;  %p417_p2 = scmp.lt.s32.totalorder %s252_s12, %s252_s12 }
  0x29   :  { %292 = vmatprep.subr.mxu0 %v443_v0  ;;  %311 = vmatprep.subr.mxu1 %v443_v0  ;;  %v62_v12 = vld [vmem:[#allocation5 + $0x8] sm:$0xff]  ;;  %v161_v13 = vld [vmem:[#allocation7 + $0x50] sm:$0xff]  ;;  %v61_v14 = vld [vmem:[#allocation5] sm:$0xff]  ;;  %p413_p1 = scmp.ne.s32.totalorder %s252_s12, %s412_s13  ;;  %p418_p3 = scmp.lt.s32.totalorder %s412_s13, %s412_s13 }
  0x2a   :  { %293 = vmatpush3.msra.mxu0 %v67_v2  ;;  %312 = vmatpush3.msra.mxu1 %v165_v5  ;;  %v60_v15 = vld [vmem:[#allocation2] sm:$0xff]  ;;  %v160_v16 = vld [vmem:[#allocation7 + $0x48] sm:$0xff]  ;;  %v159_v17 = vld [vmem:[#allocation7 + $0x40] sm:$0xff] }
  0x2b   :  { %294 = vmatprep.subr.mxu0 %v443_v0  ;;  %313 = vmatprep.subr.mxu1 %v443_v0  ;;  %v158_v18 = vld [vmem:[#allocation7 + $0x38] sm:$0xff]  ;;  %v157_v19 = vld [vmem:[#allocation7 + $0x30] sm:$0xff]  ;;  %v156_v20 = vld [vmem:[#allocation7 + $0x28] sm:$0xff]  ;;  %p419_p4 = por %p418_p3, %p417_p2 }
  0x2c   :  { %295 = vmatpush3.msra.mxu0 %v66_v3  ;;  %314 = vmatpush3.msra.mxu1 %v164_v7  ;;  %v155_v21 = vld [vmem:[#allocation7 + $0x20] sm:$0xff]  ;;  %v154_v22 = vld [vmem:[#allocation7 + $0x18] sm:$0xff]  ;;  %v153_v23 = vld [vmem:[#allocation7 + $0x10] sm:$0xff] }
  0x2d   :  { %296 = vmatprep.subr.mxu0 %v443_v0  ;;  %315 = vmatprep.subr.mxu1 %v443_v0  ;;  %v152_v24 = vld [vmem:[#allocation7 + $0x8] sm:$0xff]  ;;  %v151_v25 = vld [vmem:[#allocation7] sm:$0xff]  ;;  %v261_v26 = vld [vmem:[%s522_s2] ss:$0 sm:$0xff]  ;;  %p420_p5 = pnand %p419_p4, %p413_p1 }
  0x2e   :  { %297 = vmatpush3.msra.mxu0 %v65_v6  ;;  %316 = vmatpush3.msra.mxu1 %v163_v9  ;;  %v263_v31 = vld [vmem:[%s524_s4] ss:$0 sm:$0xff] }
  0x2f   :  { %298 = vmatprep.subr.mxu0 %v443_v0  ;;  %317 = vmatprep.subr.mxu1 %v443_v0 }
  0x30   :  { %299 = vmatpush3.msra.mxu0 %v64_v8  ;;  %318 = vmatpush3.msra.mxu1 %v162_v11 }
  0x31   :  { %300 = vmatprep.subr.mxu0 %v443_v0  ;;  %319 = vmatprep.subr.mxu1 %v443_v0 }
  0x32   :  { %301 = vmatpush3.msra.mxu0 %v63_v10  ;;  %320 = vmatpush3.msra.mxu1 %v161_v13 }
  0x33   :  { %302 = vmatprep.subr.mxu0 %v443_v0  ;;  %321 = vmatprep.subr.mxu1 %v443_v0 }
  0x34   :  { %303 = vmatpush3.msra.mxu0 %v62_v12  ;;  %322 = vmatpush3.msra.mxu1 %v160_v16 }
  0x35   :  { %304 = vmatprep.subr.mxu0 %v443_v0  ;;  %323 = vmatprep.subr.mxu1 %v443_v0 }
  0x36   :  { %305 = vmatpush3.msra.mxu0 %v61_v14  ;;  %324 = vmatpush3.msra.mxu1 %v159_v17 }
  0x37   :  { %307 = vmatmul.mubr.msk.f32.vlgmr.msra.gmra.mxu0 %vm76_vm1, %v60_v15  ;;  %325 = vmatprep.subr.mxu1 %v443_v0 }
  0x38   :  { %326 = vmatpush3.msra.mxu1 %v158_v18 }
  0x39   :  { %327 = vmatprep.subr.mxu1 %v443_v0 }
  0x3a   :  { %328 = vmatpush3.msra.mxu1 %v157_v19 }
  0x3b   :  { %329 = vmatprep.subr.mxu1 %v443_v0 }
  0x3c   :  { %330 = vmatpush3.msra.mxu1 %v156_v20 }
  0x3d   :  { %331 = vmatprep.subr.mxu1 %v443_v0 }
  0x3e   :  { %332 = vmatpush3.msra.mxu1 %v155_v21 }
  0x3f   :  { %333 = vmatprep.subr.mxu1 %v443_v0 }
  0x40   :  { %334 = vmatpush3.msra.mxu1 %v154_v22 }
  0x41   :  { %335 = vmatprep.subr.mxu1 %v443_v0 }
  0x42   :  { %336 = vmatpush3.msra.mxu1 %v153_v23 }
  0x43   :  { %337 = vmatprep.subr.mxu1 %v443_v0 }
  0x44   :  { %338 = vmatpush3.msra.mxu1 %v152_v24 }
  0x45   :  { %339 = vmatprep.subr.mxu1 %v443_v0 }
  0x46   :  { %340 = vmatpush3.msra.mxu1 %v151_v25 }
  0xf7   :  { %v146_v27 = vpop.f32.mrf.mxu0 }
  0xf8   :  { %v147_v28 = vadd.f32 %v261_v26, %v146_v27 }
  0xf9   :  { %v308_v29 = vpop.f32.mrf.mxu0 }
  0xfa   :  { %v150_v30 = vmax.f32 %v147_v28, 0.0 }
  0xfc   :  { %342 = vmatmul.mubr.f32.vlgmr.msra.gmra.mxu1 %v150_v30 }
 0x1bc   :  { %v240_v32 = vpop.f32.mrf.mxu1 }
 0x1bd   :  { %v241_v33 = vadd.f32 %v263_v31, %v240_v32 }
 0x1be   :  { %v343_v34 = vpop.f32.mrf.mxu1 }
 0x1bf   :  { %244 = vst [vmem:[#allocation8] sm:$0xff] %v241_v33 }
 0x1c0   :  { %423 = shalt.err (!%p420_p5)
}
 0x1c1   :  { %254 = dma.vmem_to_hbm [thread:$0]  %s252_s12, 128, %s525_s5, [#allocation4]  }
 0x1c2   :  { %436 = dma.done.wait [#allocation4], 128  }
 0x1c3   :  { %437 = vsyncadd [#allocation4], 4294967168 }
 0x1c4   :  { %258 = vsyncpa [#allocation3], 1 }
 0x1c5   :  { %259 = vsyncpa [#allocation6], 1 }
 0x1c6   :  { %260 = vsyncpa [#allocation4], 1 }

</bundles_post_ra>
